<compile_context>
chip_gen: v6e
topology: v6e:2x2x1
jax: 0.10.0
libtpu: 0.0.40
codegen_flags: <defaults>
</compile_context>

<pallas_src>
import functools

import jax
import jax.numpy as jnp
from jax import lax
from jax.experimental import pallas as pl
from jax.experimental.pallas import tpu as pltpu

EPS = 1e-5


# --------------------------------------------------------------------------
# Kernel
# --------------------------------------------------------------------------
def encoder_block_kernel(x_ref, b1_ref, sb1_ref, b2_ref, sb2_ref, out_ref,
                         xpad_ref, ypad_ref, *, N, H, W, Cin, Cout):
    """Whole batch in one invocation.

    x_ref   : (N, H, W*Cin)            input, lanes = (w, ci)
    b1_ref  : (3, W*Cin,  W*Cout)      banded conv1 weights, one per kh tap
    sb1_ref : (2, W*Cout)              [scale; bias] per lane (BN+bias folded)
    b2_ref  : (3, W*Cout, W*Cout)      banded conv2 weights (pool-permuted cols)
    sb2_ref : (2, W*Cout)
    out_ref : (N*(H//2), (W//2)*Cout)  pooled output, lanes = (wo, co)
    xpad_ref: (N, H+2, W*Cin)   VMEM scratch (vertical halo rows)
    ypad_ref: (N, H+2, W*Cout)  VMEM scratch
    """
    Lin = W * Cin
    Lmid = W * Cout
    f32 = jnp.float32

    # ---- stage input with vertical halo (only the 2 halo rows are zeroed) ----
    xpad_ref[:, 0:1, :] = jnp.zeros((N, 1, Lin), f32)
    xpad_ref[:, H + 1:H + 2, :] = jnp.zeros((N, 1, Lin), f32)
    xpad_ref[:, 1:H + 1, :] = x_ref[...]

    # ---- conv1: 3 banded matmuls (one per kh tap) + folded BN + ReLU ----
    acc = jnp.dot(xpad_ref[:, 0:H, :].reshape(N * H, Lin), b1_ref[0],
                  preferred_element_type=f32)
    for kh in (1, 2):
        lhs = xpad_ref[:, kh:kh + H, :].reshape(N * H, Lin)
        acc = acc + jnp.dot(lhs, b1_ref[kh], preferred_element_type=f32)
    y1 = jnp.maximum(acc * sb1_ref[0:1, :] + sb1_ref[1:2, :], 0.0)  # (N*H, Lmid)

    # ---- stage padded intermediate ----
    ypad_ref[:, 0:1, :] = jnp.zeros((N, 1, Lmid), f32)
    ypad_ref[:, H + 1:H + 2, :] = jnp.zeros((N, 1, Lmid), f32)
    ypad_ref[:, 1:H + 1, :] = y1.reshape(N, H, Lmid)

    # ---- conv2 (output lanes permuted so pooling is slice + max) ----
    acc2 = jnp.dot(ypad_ref[:, 0:H, :].reshape(N * H, Lmid), b2_ref[0],
                   preferred_element_type=f32)
    for kh in (1, 2):
        lhs = ypad_ref[:, kh:kh + H, :].reshape(N * H, Lmid)
        acc2 = acc2 + jnp.dot(lhs, b2_ref[kh], preferred_element_type=f32)
    y2 = jnp.maximum(acc2 * sb2_ref[0:1, :] + sb2_ref[1:2, :], 0.0)  # (N*H, Lmid)

    # ---- MaxPool2d(2,2) ----
    # height: adjacent row pairs (rows are (n, h) with H even).
    hp = jnp.max(y2.reshape(N * (H // 2), 2, Lmid), axis=1)          # (N*H/2, Lmid)
    # width: even-w columns live in lanes [:half], odd-w in [half:] (same
    # (wo, co) ordering inside each half, by construction of b2's columns).
    half = (W // 2) * Cout
    out_ref[...] = jnp.maximum(hp[:, :half], hp[:, half:])


# --------------------------------------------------------------------------
# Parameter / weight-matrix construction (wrapper side, one-time, tiny)
# --------------------------------------------------------------------------
def init_params(key, in_channels, out_channels):
    ks = jax.random.split(key, 12)
    p = {}
    # conv weights stored HWIO (3, 3, Cin, Cout)
    p["w1"] = 0.1 * jax.random.normal(ks[0], (3, 3, in_channels, out_channels), jnp.float32)
    p["b1"] = 0.1 * jax.random.normal(ks[1], (out_channels,), jnp.float32)
    p["gamma1"] = 1.0 + 0.1 * jax.random.normal(ks[2], (out_channels,), jnp.float32)
    p["beta1"] = 0.1 * jax.random.normal(ks[3], (out_channels,), jnp.float32)
    p["mean1"] = 0.1 * jax.random.normal(ks[4], (out_channels,), jnp.float32)
    p["var1"] = jax.random.uniform(ks[5], (out_channels,), jnp.float32, 0.5, 1.5)

    p["w2"] = 0.1 * jax.random.normal(ks[6], (3, 3, out_channels, out_channels), jnp.float32)
    p["b2"] = 0.1 * jax.random.normal(ks[7], (out_channels,), jnp.float32)
    p["gamma2"] = 1.0 + 0.1 * jax.random.normal(ks[8], (out_channels,), jnp.float32)
    p["beta2"] = 0.1 * jax.random.normal(ks[9], (out_channels,), jnp.float32)
    p["mean2"] = 0.1 * jax.random.normal(ks[10], (out_channels,), jnp.float32)
    p["var2"] = jax.random.uniform(ks[11], (out_channels,), jnp.float32, 0.5, 1.5)
    return p


def build_banded_conv_matrix(w_hwio, W, pool_permute):
    """Fold the 3 width taps + horizontal zero padding of a 3x3 conv into a
    block-banded matrix per vertical tap.

    Returns B of shape (3, W*Ci, W*Co) with
        B[kh][(w+kw-1)*Ci + ci, col(w, co)] = w_hwio[kh, kw, ci, co]
    (entries with w+kw-1 outside [0, W) are dropped == zero padding).
    col(w, co) = w*Co + co, or the 2x2-pool-friendly permutation if
    pool_permute (even-w columns first, then odd-w, each ordered (wo, co)).
    """
    _, _, Ci, Co = w_hwio.shape
    mats = []
    for kh in range(3):
        m = sum(jnp.kron(jnp.eye(W, k=1 - kw, dtype=jnp.float32), w_hwio[kh, kw])
                for kw in range(3))                       # (W*Ci, W*Co)
        mats.append(m)
    B = jnp.stack(mats)                                   # (3, W*Ci, W*Co)
    if pool_permute:
        w = jnp.arange(W)[:, None]
        co = jnp.arange(Co)[None, :]
        std_col = w * Co + co                                       # (W, Co)
        new_col = (w % 2) * (W // 2) * Co + (w // 2) * Co + co      # (W, Co)
        src = jnp.zeros((W * Co,), jnp.int32).at[new_col.reshape(-1)].set(
            std_col.reshape(-1))
        B = B[:, :, src]
    return B


def fold_bn_lanes(gamma, beta, mean, var, conv_bias, W):
    """Eval-mode BN + conv bias folded into per-lane scale/bias (tiled over W)."""
    scale = gamma / jnp.sqrt(var + EPS)
    bias = beta + (conv_bias - mean) * scale
    return jnp.stack([jnp.tile(scale, W), jnp.tile(bias, W)])   # (2, W*Cout)


# --------------------------------------------------------------------------
# Wrapper
# --------------------------------------------------------------------------
def encoder_block(x_nchw, params):
    """Pallas implementation of EncoderBlock.forward (eval mode, no dropout)."""
    N, Cin, H, W = x_nchw.shape
    Cout = params["w1"].shape[-1]
    assert H % 2 == 0 and W % 2 == 0, "MaxPool2d(2,2) needs even H, W"
    # TODO(synk): H-strip tiling with a 1-row halo is needed for large H/W/C;
    # this single-block version targets small shapes (whole image in VMEM).

    Lin, Lmid, Lout = W * Cin, W * Cout, (W // 2) * Cout

    # NCHW -> NHWC, then fold (W, C) into the lane axis (row-major reshape).
    x = jnp.transpose(x_nchw, (0, 2, 3, 1)).astype(jnp.float32).reshape(N, H, Lin)

    b1 = build_banded_conv_matrix(params["w1"], W, pool_permute=False)  # (3, Lin, Lmid)
    b2 = build_banded_conv_matrix(params["w2"], W, pool_permute=True)   # (3, Lmid, Lmid)
    sb1 = fold_bn_lanes(params["gamma1"], params["beta1"], params["mean1"],
                        params["var1"], params["b1"], W)
    sb2 = fold_bn_lanes(params["gamma2"], params["beta2"], params["mean2"],
                        params["var2"], params["b2"], W)

    kernel = functools.partial(encoder_block_kernel,
                               N=N, H=H, W=W, Cin=Cin, Cout=Cout)

    out2d = pl.pallas_call(
        kernel,
        out_shape=jax.ShapeDtypeStruct((N * (H // 2), Lout), jnp.float32),
        grid_spec=pltpu.PrefetchScalarGridSpec(
            num_scalar_prefetch=0,
            grid=(1,),  # whole batch folded into one step (M = N*H)
            in_specs=[
                pl.BlockSpec((N, H, Lin), lambda i: (0, 0, 0)),
                pl.BlockSpec((3, Lin, Lmid), lambda i: (0, 0, 0)),
                pl.BlockSpec((2, Lmid), lambda i: (0, 0)),
                pl.BlockSpec((3, Lmid, Lmid), lambda i: (0, 0, 0)),
                pl.BlockSpec((2, Lmid), lambda i: (0, 0)),
            ],
            out_specs=pl.BlockSpec((N * (H // 2), Lout), lambda i: (0, 0)),
            scratch_shapes=[
                pltpu.VMEM((N, H + 2, Lin), jnp.float32),   # padded input
                pltpu.VMEM((N, H + 2, Lmid), jnp.float32),  # padded conv1 out
            ],
        ),
        compiler_params=pltpu.CompilerParams(
            dimension_semantics=("parallel",)),
    )(x, b1, sb1, b2, sb2)

    out = out2d.reshape(N, H // 2, W // 2, Cout)
    return jnp.transpose(out, (0, 3, 1, 2))  # back to NCHW


# --------------------------------------------------------------------------
# Pure-JAX reference (eval-mode BN), high precision = ground truth
# --------------------------------------------------------------------------
def encoder_block_reference(x_nchw, params):
    x = jnp.transpose(x_nchw, (0, 2, 3, 1)).astype(jnp.float32)

    def conv_bn_relu(x, w, b, gamma, beta, mean, var):
        y = lax.conv_general_dilated(
            x, w, (1, 1), "SAME",
            dimension_numbers=("NHWC", "HWIO", "NHWC"),
            precision=lax.Precision.HIGHEST) + b
        y = (y - mean) / jnp.sqrt(var + EPS) * gamma + beta
        return jnp.maximum(y, 0.0)

    y = conv_bn_relu(x, params["w1"], params["b1"], params["gamma1"],
                     params["beta1"], params["mean1"], params["var1"])
    y = conv_bn_relu(y, params["w2"], params["b2"], params["gamma2"],
                     params["beta2"], params["mean2"], params["var2"])
    y = lax.reduce_window(y, -jnp.inf, lax.max,
                          (1, 2, 2, 1), (1, 2, 2, 1), "VALID")
    return jnp.transpose(y, (0, 3, 1, 2))


if __name__ == "__main__":
    # small shapes consistent with the module: N=2, Cin=4, Cout=8, H=W=16
    N, Cin, Cout, H, W = 2, 4, 8, 16, 16

    key = jax.random.PRNGKey(0)
    kx, kp = jax.random.split(key)
    x = jax.random.normal(kx, (N, Cin, H, W), jnp.float32)   # NCHW, as in torch
    params = init_params(kp, Cin, Cout)

    # TODO(synk): nn.Dropout path (dropout=True) not implemented; default is False.
    out = encoder_block(x, params)
    out = jax.block_until_ready(out)

    ref = encoder_block_reference(x, params)
    assert out.shape == (N, Cout, H // 2, W // 2), out.shape
    # tolerance re-validated for default (single bf16-pass) MXU precision
    assert jnp.allclose(out, ref, rtol=2e-2, atol=2e-2), \
        float(jnp.max(jnp.abs(out - ref)))

    print("KERNEL_OK")
</pallas_src>

<mosaic_0001>
module attributes {stable_mosaic.version = 11 : i64} {
  func.func @encoder_block_kernel(%arg0: i32, %arg1: memref<2x16x64xf32, #tpu.memory_space<vmem>>, %arg2: memref<3x64x128xf32, #tpu.memory_space<vmem>>, %arg3: memref<2x128xf32, #tpu.memory_space<vmem>>, %arg4: memref<3x128x128xf32, #tpu.memory_space<vmem>>, %arg5: memref<2x128xf32, #tpu.memory_space<vmem>>, %arg6: memref<16x64xf32, #tpu.memory_space<vmem>>, %arg7: memref<2x18x64xf32, #tpu.memory_space<vmem>>, %arg8: memref<2x18x128xf32, #tpu.memory_space<vmem>>) attributes {dimension_semantics = [#tpu.dimension_semantics<parallel>], iteration_bounds = array<i64: 1>, scalar_prefetch = 0 : i64, scratch_operands = 2 : i64, tpu.core_type = #tpu.core_type<tc>, window_params = [{pipeline_mode = #tpu.pipeline_mode<synchronous>, transform_indices = @transform_0, window_bounds = array<i64: 2, 16, 64>}, {pipeline_mode = #tpu.pipeline_mode<synchronous>, transform_indices = @transform_1, window_bounds = array<i64: 3, 64, 128>}, {pipeline_mode = #tpu.pipeline_mode<synchronous>, transform_indices = @transform_2, window_bounds = array<i64: 2, 128>}, {pipeline_mode = #tpu.pipeline_mode<synchronous>, transform_indices = @transform_3, window_bounds = array<i64: 3, 128, 128>}, {pipeline_mode = #tpu.pipeline_mode<synchronous>, transform_indices = @transform_4, window_bounds = array<i64: 2, 128>}, {pipeline_mode = #tpu.pipeline_mode<synchronous>, transform_indices = @transform_5, window_bounds = array<i64: 16, 64>}]} {
    %cst = arith.constant 0.000000e+00 : f32
    %0 = vector.broadcast %cst : f32 to vector<2x1x64xf32>
    %c0 = arith.constant 0 : index
    %c0_0 = arith.constant 0 : index
    %c0_1 = arith.constant 0 : index
    %1 = vector.load %arg7[%c0, %c0_0, %c0_1] : memref<2x18x64xf32, #tpu.memory_space<vmem>>, vector<2x1x64xf32>
    tpu.vector_store %arg7[%c0, %c0_0, %c0_1], %0 {strides = array<i32>} : memref<2x18x64xf32, #tpu.memory_space<vmem>>, vector<2x1x64xf32>,
    %cst_2 = arith.constant 0.000000e+00 : f32
    %2 = vector.broadcast %cst_2 : f32 to vector<2x1x64xf32>
    %c0_3 = arith.constant 0 : index
    %c17 = arith.constant 17 : index
    %c0_4 = arith.constant 0 : index
    %3 = vector.load %arg7[%c0_3, %c17, %c0_4] : memref<2x18x64xf32, #tpu.memory_space<vmem>>, vector<2x1x64xf32>
    tpu.vector_store %arg7[%c0_3, %c17, %c0_4], %2 {strides = array<i32>} : memref<2x18x64xf32, #tpu.memory_space<vmem>>, vector<2x1x64xf32>,
    %c0_5 = arith.constant 0 : index
    %c0_6 = arith.constant 0 : index
    %c0_7 = arith.constant 0 : index
    %4 = vector.load %arg1[%c0_5, %c0_6, %c0_7] : memref<2x16x64xf32, #tpu.memory_space<vmem>>, vector<2x16x64xf32>
    %c0_8 = arith.constant 0 : index
    %c1 = arith.constant 1 : index
    %c0_9 = arith.constant 0 : index
    %5 = vector.load %arg7[%c0_8, %c1, %c0_9] : memref<2x18x64xf32, #tpu.memory_space<vmem>>, vector<2x16x64xf32>
    tpu.vector_store %arg7[%c0_8, %c1, %c0_9], %4 {strides = array<i32>} : memref<2x18x64xf32, #tpu.memory_space<vmem>>, vector<2x16x64xf32>,
    %c0_10 = arith.constant 0 : index
    %c0_11 = arith.constant 0 : index
    %c0_12 = arith.constant 0 : index
    %6 = vector.load %arg7[%c0_10, %c0_11, %c0_12] : memref<2x18x64xf32, #tpu.memory_space<vmem>>, vector<2x16x64xf32>
    %7 = vector.shape_cast %6 : vector<2x16x64xf32> to vector<32x64xf32>
    %c0_13 = arith.constant 0 : index
    %c0_14 = arith.constant 0 : index
    %c0_15 = arith.constant 0 : index
    %8 = vector.load %arg2[%c0_13, %c0_14, %c0_15] : memref<3x64x128xf32, #tpu.memory_space<vmem>>, vector<1x64x128xf32>
    %9 = vector.shape_cast %8 : vector<1x64x128xf32> to vector<64x128xf32>
    %cst_16 = arith.constant dense<0.000000e+00> : vector<32x128xf32>
    %10 = tpu.matmul %7, %9, %cst_16 {dimension_numbers = #tpu.dot_dimension_numbers<[1], [0], [0], [1], [0, 0, 1, 1], [], []>} : vector<32x64xf32>, vector<64x128xf32>, vector<32x128xf32> -> vector<32x128xf32>
    %c0_17 = arith.constant 0 : index
    %c1_18 = arith.constant 1 : index
    %c0_19 = arith.constant 0 : index
    %11 = vector.load %arg7[%c0_17, %c1_18, %c0_19] : memref<2x18x64xf32, #tpu.memory_space<vmem>>, vector<2x16x64xf32>
    %12 = vector.shape_cast %11 : vector<2x16x64xf32> to vector<32x64xf32>
    %c1_20 = arith.constant 1 : index
    %c0_21 = arith.constant 0 : index
    %c0_22 = arith.constant 0 : index
    %13 = vector.load %arg2[%c1_20, %c0_21, %c0_22] : memref<3x64x128xf32, #tpu.memory_space<vmem>>, vector<1x64x128xf32>
    %14 = vector.shape_cast %13 : vector<1x64x128xf32> to vector<64x128xf32>
    %cst_23 = arith.constant dense<0.000000e+00> : vector<32x128xf32>
    %15 = tpu.matmul %12, %14, %cst_23 {dimension_numbers = #tpu.dot_dimension_numbers<[1], [0], [0], [1], [0, 0, 1, 1], [], []>} : vector<32x64xf32>, vector<64x128xf32>, vector<32x128xf32> -> vector<32x128xf32>
    %16 = arith.addf %10, %15 : vector<32x128xf32>
    %c0_24 = arith.constant 0 : index
    %c2 = arith.constant 2 : index
    %c0_25 = arith.constant 0 : index
    %17 = vector.load %arg7[%c0_24, %c2, %c0_25] : memref<2x18x64xf32, #tpu.memory_space<vmem>>, vector<2x16x64xf32>
    %18 = vector.shape_cast %17 : vector<2x16x64xf32> to vector<32x64xf32>
    %c2_26 = arith.constant 2 : index
    %c0_27 = arith.constant 0 : index
    %c0_28 = arith.constant 0 : index
    %19 = vector.load %arg2[%c2_26, %c0_27, %c0_28] : memref<3x64x128xf32, #tpu.memory_space<vmem>>, vector<1x64x128xf32>
    %20 = vector.shape_cast %19 : vector<1x64x128xf32> to vector<64x128xf32>
    %cst_29 = arith.constant dense<0.000000e+00> : vector<32x128xf32>
    %21 = tpu.matmul %18, %20, %cst_29 {dimension_numbers = #tpu.dot_dimension_numbers<[1], [0], [0], [1], [0, 0, 1, 1], [], []>} : vector<32x64xf32>, vector<64x128xf32>, vector<32x128xf32> -> vector<32x128xf32>
    %22 = arith.addf %16, %21 : vector<32x128xf32>
    %c0_30 = arith.constant 0 : index
    %c0_31 = arith.constant 0 : index
    %23 = vector.load %arg3[%c0_30, %c0_31] : memref<2x128xf32, #tpu.memory_space<vmem>>, vector<1x128xf32>
    %24 = vector.broadcast %23 : vector<1x128xf32> to vector<32x128xf32>
    %25 = arith.mulf %22, %24 : vector<32x128xf32>
    %c1_32 = arith.constant 1 : index
    %c0_33 = arith.constant 0 : index
    %26 = vector.load %arg3[%c1_32, %c0_33] : memref<2x128xf32, #tpu.memory_space<vmem>>, vector<1x128xf32>
    %27 = vector.broadcast %26 : vector<1x128xf32> to vector<32x128xf32>
    %28 = arith.addf %25, %27 : vector<32x128xf32>
    %cst_34 = arith.constant 0.000000e+00 : f32
    %29 = vector.broadcast %cst_34 : f32 to vector<32x128xf32>
    %30 = arith.maximumf %28, %29 : vector<32x128xf32>
    %cst_35 = arith.constant 0.000000e+00 : f32
    %31 = vector.broadcast %cst_35 : f32 to vector<2x1x128xf32>
    %c0_36 = arith.constant 0 : index
    %c0_37 = arith.constant 0 : index
    %c0_38 = arith.constant 0 : index
    %32 = vector.load %arg8[%c0_36, %c0_37, %c0_38] : memref<2x18x128xf32, #tpu.memory_space<vmem>>, vector<2x1x128xf32>
    tpu.vector_store %arg8[%c0_36, %c0_37, %c0_38], %31 {strides = array<i32>} : memref<2x18x128xf32, #tpu.memory_space<vmem>>, vector<2x1x128xf32>,
    %cst_39 = arith.constant 0.000000e+00 : f32
    %33 = vector.broadcast %cst_39 : f32 to vector<2x1x128xf32>
    %c0_40 = arith.constant 0 : index
    %c17_41 = arith.constant 17 : index
    %c0_42 = arith.constant 0 : index
    %34 = vector.load %arg8[%c0_40, %c17_41, %c0_42] : memref<2x18x128xf32, #tpu.memory_space<vmem>>, vector<2x1x128xf32>
    tpu.vector_store %arg8[%c0_40, %c17_41, %c0_42], %33 {strides = array<i32>} : memref<2x18x128xf32, #tpu.memory_space<vmem>>, vector<2x1x128xf32>,
    %35 = vector.shape_cast %30 : vector<32x128xf32> to vector<2x16x128xf32>
    %c0_43 = arith.constant 0 : index
    %c1_44 = arith.constant 1 : index
    %c0_45 = arith.constant 0 : index
    %36 = vector.load %arg8[%c0_43, %c1_44, %c0_45] : memref<2x18x128xf32, #tpu.memory_space<vmem>>, vector<2x16x128xf32>
    tpu.vector_store %arg8[%c0_43, %c1_44, %c0_45], %35 {strides = array<i32>} : memref<2x18x128xf32, #tpu.memory_space<vmem>>, vector<2x16x128xf32>,
    %c0_46 = arith.constant 0 : index
    %c0_47 = arith.constant 0 : index
    %c0_48 = arith.constant 0 : index
    %37 = vector.load %arg8[%c0_46, %c0_47, %c0_48] : memref<2x18x128xf32, #tpu.memory_space<vmem>>, vector<2x16x128xf32>
    %38 = vector.shape_cast %37 : vector<2x16x128xf32> to vector<32x128xf32>
    %c0_49 = arith.constant 0 : index
    %c0_50 = arith.constant 0 : index
    %c0_51 = arith.constant 0 : index
    %39 = vector.load %arg4[%c0_49, %c0_50, %c0_51] : memref<3x128x128xf32, #tpu.memory_space<vmem>>, vector<1x128x128xf32>
    %40 = vector.shape_cast %39 : vector<1x128x128xf32> to vector<128x128xf32>
    %cst_52 = arith.constant dense<0.000000e+00> : vector<32x128xf32>
    %41 = tpu.matmul %38, %40, %cst_52 {dimension_numbers = #tpu.dot_dimension_numbers<[1], [0], [0], [1], [0, 0, 1, 1], [], []>} : vector<32x128xf32>, vector<128x128xf32>, vector<32x128xf32> -> vector<32x128xf32>
    %c0_53 = arith.constant 0 : index
    %c1_54 = arith.constant 1 : index
    %c0_55 = arith.constant 0 : index
    %42 = vector.load %arg8[%c0_53, %c1_54, %c0_55] : memref<2x18x128xf32, #tpu.memory_space<vmem>>, vector<2x16x128xf32>
    %43 = vector.shape_cast %42 : vector<2x16x128xf32> to vector<32x128xf32>
    %c1_56 = arith.constant 1 : index
    %c0_57 = arith.constant 0 : index
    %c0_58 = arith.constant 0 : index
    %44 = vector.load %arg4[%c1_56, %c0_57, %c0_58] : memref<3x128x128xf32, #tpu.memory_space<vmem>>, vector<1x128x128xf32>
    %45 = vector.shape_cast %44 : vector<1x128x128xf32> to vector<128x128xf32>
    %cst_59 = arith.constant dense<0.000000e+00> : vector<32x128xf32>
    %46 = tpu.matmul %43, %45, %cst_59 {dimension_numbers = #tpu.dot_dimension_numbers<[1], [0], [0], [1], [0, 0, 1, 1], [], []>} : vector<32x128xf32>, vector<128x128xf32>, vector<32x128xf32> -> vector<32x128xf32>
    %47 = arith.addf %41, %46 : vector<32x128xf32>
    %c0_60 = arith.constant 0 : index
    %c2_61 = arith.constant 2 : index
    %c0_62 = arith.constant 0 : index
    %48 = vector.load %arg8[%c0_60, %c2_61, %c0_62] : memref<2x18x128xf32, #tpu.memory_space<vmem>>, vector<2x16x128xf32>
    %49 = vector.shape_cast %48 : vector<2x16x128xf32> to vector<32x128xf32>
    %c2_63 = arith.constant 2 : index
    %c0_64 = arith.constant 0 : index
    %c0_65 = arith.constant 0 : index
    %50 = vector.load %arg4[%c2_63, %c0_64, %c0_65] : memref<3x128x128xf32, #tpu.memory_space<vmem>>, vector<1x128x128xf32>
    %51 = vector.shape_cast %50 : vector<1x128x128xf32> to vector<128x128xf32>
    %cst_66 = arith.constant dense<0.000000e+00> : vector<32x128xf32>
    %52 = tpu.matmul %49, %51, %cst_66 {dimension_numbers = #tpu.dot_dimension_numbers<[1], [0], [0], [1], [0, 0, 1, 1], [], []>} : vector<32x128xf32>, vector<128x128xf32>, vector<32x128xf32> -> vector<32x128xf32>
    %53 = arith.addf %47, %52 : vector<32x128xf32>
    %c0_67 = arith.constant 0 : index
    %c0_68 = arith.constant 0 : index
    %54 = vector.load %arg5[%c0_67, %c0_68] : memref<2x128xf32, #tpu.memory_space<vmem>>, vector<1x128xf32>
    %55 = vector.broadcast %54 : vector<1x128xf32> to vector<32x128xf32>
    %56 = arith.mulf %53, %55 : vector<32x128xf32>
    %c1_69 = arith.constant 1 : index
    %c0_70 = arith.constant 0 : index
    %57 = vector.load %arg5[%c1_69, %c0_70] : memref<2x128xf32, #tpu.memory_space<vmem>>, vector<1x128xf32>
    %58 = vector.broadcast %57 : vector<1x128xf32> to vector<32x128xf32>
    %59 = arith.addf %56, %58 : vector<32x128xf32>
    %cst_71 = arith.constant 0.000000e+00 : f32
    %60 = vector.broadcast %cst_71 : f32 to vector<32x128xf32>
    %61 = arith.maximumf %59, %60 : vector<32x128xf32>
    %62 = vector.shape_cast %61 : vector<32x128xf32> to vector<16x2x128xf32>
    %cst_72 = arith.constant dense<0xFF800000> : vector<16x128xf32>
    %63 = vector.multi_reduction <maximumf>, %62, %cst_72 [1] : vector<16x2x128xf32> to vector<16x128xf32>
    %64 = vector.extract_strided_slice %63 {offsets = [0, 0], sizes = [16, 64], strides = [1, 1]} : vector<16x128xf32> to vector<16x64xf32>
    %65 = vector.extract_strided_slice %63 {offsets = [0, 64], sizes = [16, 64], strides = [1, 1]} : vector<16x128xf32> to vector<16x64xf32>
    %66 = arith.maximumf %64, %65 : vector<16x64xf32>
    %c0_73 = arith.constant 0 : index
    %c0_74 = arith.constant 0 : index
    %67 = vector.load %arg6[%c0_73, %c0_74] : memref<16x64xf32, #tpu.memory_space<vmem>>, vector<16x64xf32>
    tpu.vector_store %arg6[%c0_73, %c0_74], %66 {strides = array<i32>} : memref<16x64xf32, #tpu.memory_space<vmem>>, vector<16x64xf32>,
    return
  }
  func.func @transform_0(%arg0: i32) -> (i32, i32, i32) {
    %c0_i32 = arith.constant 0 : i32
    %c0_i32_0 = arith.constant 0 : i32
    %c0_i32_1 = arith.constant 0 : i32
    %c0_i32_2 = arith.constant 0 : i32
    return %c0_i32, %c0_i32_0, %c0_i32_1 : i32, i32, i32
  }
  func.func @transform_1(%arg0: i32) -> (i32, i32, i32) {
    %c0_i32 = arith.constant 0 : i32
    %c0_i32_0 = arith.constant 0 : i32
    %c0_i32_1 = arith.constant 0 : i32
    %c0_i32_2 = arith.constant 0 : i32
    return %c0_i32, %c0_i32_0, %c0_i32_1 : i32, i32, i32
  }
  func.func @transform_2(%arg0: i32) -> (i32, i32) {
    %c0_i32 = arith.constant 0 : i32
    %c0_i32_0 = arith.constant 0 : i32
    %c0_i32_1 = arith.constant 0 : i32
    return %c0_i32, %c0_i32_0 : i32, i32
  }
  func.func @transform_3(%arg0: i32) -> (i32, i32, i32) {
    %c0_i32 = arith.constant 0 : i32
    %c0_i32_0 = arith.constant 0 : i32
    %c0_i32_1 = arith.constant 0 : i32
    %c0_i32_2 = arith.constant 0 : i32
    return %c0_i32, %c0_i32_0, %c0_i32_1 : i32, i32, i32
  }
  func.func @transform_4(%arg0: i32) -> (i32, i32) {
    %c0_i32 = arith.constant 0 : i32
    %c0_i32_0 = arith.constant 0 : i32
    %c0_i32_1 = arith.constant 0 : i32
    return %c0_i32, %c0_i32_0 : i32, i32
  }
  func.func @transform_5(%arg0: i32) -> (i32, i32) {
    %c0_i32 = arith.constant 0 : i32
    %c0_i32_0 = arith.constant 0 : i32
    %c0_i32_1 = arith.constant 0 : i32
    return %c0_i32, %c0_i32_0 : i32, i32
  }
}

</mosaic_0001>

<bundles_post_ra>
// kernel: tpu_custom_call.1
= control target key start
LH: loop header
LB: loop body
LE: loop exit
PB: predicated region body
PF: predicated region fallthrough
CT: control target
= control target key end

     0   :  { %10 = vsyncpa [#allocation5], 0  ;;  %s1726_s0 = inlined_call_operand.hbm [shape: f32[2,16,64], index: 0, kind: input, shape index: {}]   ;;  %s1727_s1 = inlined_call_operand.hbm [shape: f32[3,64,128], index: 1, kind: input, shape index: {}]   ;;  %s1728_s2 = inlined_call_operand.vmem [shape: f32[2,128], index: 2, kind: input, shape index: {}]   ;;  %s1729_s3 = inlined_call_operand.hbm [shape: f32[3,128,128], index: 3, kind: input, shape index: {}]   ;;  %s1730_s4 = inlined_call_operand.vmem [shape: f32[2,128], index: 4, kind: input, shape index: {}]   ;;  %s1731_s5 = inlined_call_operand.hbm [shape: f32[16,64], index: 5, kind: output, shape index: {}]  }
   0x1   :  { %11 = vsyncpa [#allocation8], 0 }
   0x2   :  { %12 = vsyncpa [#allocation6], 0  ;;  %s1523_s18 = smov [#allocation7]   ;;  %s1524_s20 = smov [#allocation4]  }
   0x3   :  { %s30_s19 = sshll.u32 %s1523_s18, 4  ;;  %s18_s21 = sshll.u32 %s1524_s20, 4  ;;  %s31_s19 = int_to_ptr.vmem [resolvable:$true] %s30_s19  ;;  %s19_s21 = int_to_ptr.vmem [resolvable:$true] %s18_s21 }
   0x4   :  { %s1445_s22 = scalar_lea.vmem %s31_s19, 3072  ;;  %p1450_p1 = scmp.lt.s32.totalorder %s31_s19, %s31_s19 }
   0x5   :  { %p1446_p0 = scmp.ne.s32.totalorder %s31_s19, %s1445_s22  ;;  %p1451_p2 = scmp.lt.s32.totalorder %s1445_s22, %s1445_s22 }
   0x7   :  { %p1452_p3 = por %p1451_p2, %p1450_p1 }
   0x9   :  { %p1453_p4 = pnand %p1452_p3, %p1446_p0 }
   0xb   :  { %1456 = shalt.err (!%p1453_p4)
}
   0xc   :  { %s1525_s23 = smov 128   ;;  %s1526_s24 = smov 8  }
   0xd   :  { %36 = dma.hbm_to_vmem [thread:$0]  %s1727_s1, 3072, %s31_s19, [#allocation8], %s1525_s23, %s1525_s23, %s1526_s24  }
   0xe   :  { %s1465_s27 = scalar_lea.vmem %s19_s21, 512  ;;  %p1470_p6 = scmp.lt.s32.totalorder %s19_s21, %s19_s21 }
   0xf   :  { %p1466_p5 = scmp.ne.s32.totalorder %s19_s21, %s1465_s27  ;;  %p1471_p7 = scmp.lt.s32.totalorder %s1465_s27, %s1465_s27 }
  0x11   :  { %p1472_p8 = por %p1471_p7, %p1470_p6 }
  0x13   :  { %p1473_p9 = pnand %p1472_p8, %p1466_p5 }
  0x15   :  { %1476 = shalt.err (!%p1473_p9)
}
  0x16   :  { %24 = dma.hbm_to_vmem [thread:$0]  %s1726_s0, 512, %s19_s21, [#allocation5], %s1525_s23, %s1525_s23, %s1526_s24  }
  0x17   :  { %s1527_s30 = smov [#allocation9]  }
  0x18   :  { %s44_s6 = sshll.u32 %s1527_s30, 4  ;;  %s45_s6 = int_to_ptr.vmem [resolvable:$true] %s44_s6 }
  0x19   :  { %s1485_s7 = scalar_lea.vmem %s45_s6, 6144  ;;  %p1490_p11 = scmp.lt.s32.totalorder %s45_s6, %s45_s6 }
  0x1a   :  { %p1486_p10 = scmp.ne.s32.totalorder %s45_s6, %s1485_s7  ;;  %p1491_p12 = scmp.lt.s32.totalorder %s1485_s7, %s1485_s7 }
  0x1c   :  { %p1492_p13 = por %p1491_p12, %p1490_p11 }
  0x1e   :  { %p1493_p0 = pnand %p1492_p13, %p1486_p10 }
  0x20   :  { %1496 = shalt.err (!%p1493_p0)
}
  0x21   :  { %50 = dma.hbm_to_vmem [thread:$0]  %s1729_s3, 6144, %s45_s6, [#allocation8], %s1525_s23, %s1525_s23, %s1526_s24  }
  0x22   :  { %1517 = dma.done.wait [#allocation5], 512  }
  0x23   :  { %1518 = vsyncadd [#allocation5], 4294966784 }
  0x24   :  { %1519 = dma.done.wait [#allocation8], 9216  }
  0x25   :  { %1520 = vsyncadd [#allocation8], 4294958080  ;;  %vm62_vm0 = vcmask 516096   ;;  %v1528_v0 = vmov 0.0   ;;  %v100_v1 = vld [vmem:[#allocation7 + $0x78] sm:$0xff]  ;;  %v99_v3 = vld [vmem:[#allocation7 + $0x70] sm:$0xff] }
  0x26   :  { %63 = vst.msk [vmem:[#allocation2] sm:$0x1] %vm62_vm0, %v1528_v0  ;;  %64 = vst.msk [vmem:[#allocation2 + $0x18] sm:$0x1] %vm62_vm0, %v1528_v0  ;;  %v87_v2 = vld [vmem:[#allocation7 + $0x38] sm:$0xff]  ;;  %1248 = vmatprep.subr.mxu0 %v100_v1  ;;  %v86_v4 = vld [vmem:[#allocation7 + $0x30] sm:$0xff] }
  0x27   :  { %65 = vst.msk [vmem:[#allocation2 + $0x11] sm:$0x1] %vm62_vm0, %v1528_v0  ;;  %66 = vst.msk [vmem:[#allocation2 + $0x29] sm:$0x1] %vm62_vm0, %v1528_v0  ;;  %1270 = vmatprep.subr.mxu1 %v87_v2  ;;  %1249 = vmatpush3.msra.mxu0 %v100_v1  ;;  %v98_v5 = vld [vmem:[#allocation7 + $0x68] sm:$0xff]  ;;  %vm71_vm1 = vcmask 523264  }
  0x28   :  { %431 = vst [vmem:[#allocation3] sm:$0x1] %v1528_v0  ;;  %432 = vst [vmem:[#allocation3 + $0x18] sm:$0x1] %v1528_v0  ;;  %1271 = vmatpush3.msra.mxu1 %v87_v2  ;;  %v85_v6 = vld [vmem:[#allocation7 + $0x28] sm:$0xff]  ;;  %1250 = vmatprep.subr.mxu0 %v99_v3  ;;  %v97_v7 = vld [vmem:[#allocation7 + $0x60] sm:$0xff] }
  0x29   :  { %433 = vst [vmem:[#allocation3 + $0x11] sm:$0x1] %v1528_v0  ;;  %434 = vst [vmem:[#allocation3 + $0x29] sm:$0x1] %v1528_v0  ;;  %1272 = vmatprep.subr.mxu1 %v86_v4  ;;  %1251 = vmatpush3.msra.mxu0 %v99_v3  ;;  %v84_v8 = vld [vmem:[#allocation7 + $0x20] sm:$0xff]  ;;  %v68_v10 = vld [vmem:[#allocation4 + $0x8] sm:$0xff] }
  0x2a   :  { %1273 = vmatpush3.msra.mxu1 %v86_v4  ;;  %1252 = vmatprep.subr.mxu0 %v98_v5  ;;  %v67_v9 = vld [vmem:[#allocation4] sm:$0xff]  ;;  %v96_v11 = vld [vmem:[#allocation7 + $0x58] sm:$0xff]  ;;  %73 = vst.msk [vmem:[#allocation2 + $0x9] sm:$0xff] %vm71_vm1, %v68_v10  ;;  %v69_v13 = vld [vmem:[#allocation4 + $0x10] sm:$0xff]  ;;  %vm870_vm2 = vcmask 1041408   ;;  %vm1080_vm3 = vcmask 1041409  }
  0x2b   :  { %1274 = vmatprep.subr.mxu1 %v85_v6  ;;  %1253 = vmatpush3.msra.mxu0 %v98_v5  ;;  %v83_v12 = vld [vmem:[#allocation7 + $0x18] sm:$0xff]  ;;  %72 = vst.msk [vmem:[#allocation2 + $0x1] sm:$0xff] %vm71_vm1, %v67_v9  ;;  %v95_v14 = vld [vmem:[#allocation7 + $0x50] sm:$0xff]  ;;  %74 = vst.msk [vmem:[#allocation2 + $0x19] sm:$0xff] %vm71_vm1, %v69_v13  ;;  %vm1083_vm4 = vcmask 1042434   ;;  %vm1086_vm5 = vcmask 1043459  }
  0x2c   :  { %1275 = vmatpush3.msra.mxu1 %v85_v6  ;;  %1254 = vmatprep.subr.mxu0 %v97_v7  ;;  %v82_v15 = vld [vmem:[#allocation7 + $0x10] sm:$0xff]  ;;  %v70_v16 = vld [vmem:[#allocation4 + $0x18] sm:$0xff]  ;;  %v94_v17 = vld [vmem:[#allocation7 + $0x48] sm:$0xff]  ;;  %vm1089_vm6 = vcmask 1044484   ;;  %vm1092_vm7 = vcmask 1045509   ;;  %vm1095_vm8 = vcmask 1046534  }
  0x2d   :  { %1276 = vmatprep.subr.mxu1 %v84_v8  ;;  %1255 = vmatpush3.msra.mxu0 %v97_v7  ;;  %75 = vst.msk [vmem:[#allocation2 + $0x21] sm:$0xff] %vm71_vm1, %v70_v16  ;;  %v81_v18 = vld [vmem:[#allocation7 + $0x8] sm:$0xff]  ;;  %v93_v19 = vld [vmem:[#allocation7 + $0x40] sm:$0xff]  ;;  %v307_v25 = vld [vmem:[#allocation7 + $0xb8] sm:$0xff]  ;;  %vm1098_vm9 = vcmask 1047559   ;;  %s1531_s14 = smov [#allocation10]  }
  0x2e   :  { %1277 = vmatpush3.msra.mxu1 %v84_v8  ;;  %1256 = vmatprep.subr.mxu0 %v96_v11  ;;  %v80_v20 = vld [vmem:[#allocation7] sm:$0xff]  ;;  %v306_v28 = vld [vmem:[#allocation7 + $0xb0] sm:$0xff]  ;;  %v305_v30 = vld [vmem:[#allocation7 + $0xa8] sm:$0xff]  ;;  %s1123_s15 = sshll.u32 %s1531_s14, 4  ;;  %s1124_s15 = int_to_ptr.vmem [resolvable:$true] %s1123_s15 }
  0x2f   :  { %1278 = vmatprep.subr.mxu1 %v83_v12  ;;  %1257 = vmatpush3.msra.mxu0 %v96_v11  ;;  %v304_v33 = vld [vmem:[#allocation7 + $0xa0] sm:$0xff]  ;;  %v303_v34 = vld [vmem:[#allocation7 + $0x98] sm:$0xff]  ;;  %v302_v35 = vld [vmem:[#allocation7 + $0x90] sm:$0xff]  ;;  %s1497_s16 = scalar_lea.vmem %s1124_s15, 256  ;;  %p1502_p2 = scmp.lt.s32.totalorder %s1124_s15, %s1124_s15 }
  0x30   :  { %1279 = vmatpush3.msra.mxu1 %v83_v12  ;;  %1258 = vmatprep.subr.mxu0 %v95_v14  ;;  %v301_v36 = vld [vmem:[#allocation7 + $0x88] sm:$0xff]  ;;  %v300_v37 = vld [vmem:[#allocation7 + $0x80] sm:$0xff]  ;;  %v479_v41 = vld [vmem:[#allocation9 + $0xf8] sm:$0xff]  ;;  %p1498_p1 = scmp.ne.s32.totalorder %s1124_s15, %s1497_s16  ;;  %p1503_p3 = scmp.lt.s32.totalorder %s1497_s16, %s1497_s16 }
  0x31   :  { %1280 = vmatprep.subr.mxu1 %v82_v15  ;;  %1259 = vmatpush3.msra.mxu0 %v95_v14  ;;  %v89_v23 = vld [vmem:[#allocation2 + $0x9] sm:$0xff]  ;;  %v476_v44 = vld [vmem:[#allocation9 + $0xe0] sm:$0xff]  ;;  %v458_v45 = vld [vmem:[#allocation9 + $0x78] sm:$0xff] }
  0x32   :  { %1281 = vmatpush3.msra.mxu1 %v82_v15  ;;  %1260 = vmatprep.subr.mxu0 %v94_v17  ;;  %v88_v21 = vld [vmem:[#allocation2 + $0x1] sm:$0xff]  ;;  %v90_v26 = vld [vmem:[#allocation2 + $0x19] sm:$0xff]  ;;  %v296_v38 = vld [vmem:[#allocation2 + $0xa] sm:$0xff]  ;;  %p1504_p4 = por %p1503_p3, %p1502_p2 }
  0x33   :  { %1282 = vmatprep.subr.mxu1 %v81_v18  ;;  %1261 = vmatpush3.msra.mxu0 %v94_v17  ;;  %v76_v22 = vld [vmem:[#allocation2] sm:$0xff]  ;;  %v77_v24 = vld [vmem:[#allocation2 + $0x8] sm:$0xff]  ;;  %v78_v27 = vld [vmem:[#allocation2 + $0x18] sm:$0xff] }
  0x34   :  { %1283 = vmatpush3.msra.mxu1 %v81_v18  ;;  %1262 = vmatprep.subr.mxu0 %v93_v19  ;;  %v79_v29 = vld [vmem:[#allocation2 + $0x20] sm:$0xff]  ;;  %v478_v42 = vld [vmem:[#allocation9 + $0xf0] sm:$0xff]  ;;  %v477_v43 = vld [vmem:[#allocation9 + $0xe8] sm:$0xff]  ;;  %p1505_p5 = pnand %p1504_p4, %p1498_p1 }
  0x35   :  { %1284 = vmatprep.subr.mxu1 %v80_v20  ;;  %1263 = vmatpush3.msra.mxu0 %v93_v19  ;;  %v91_v31 = vld [vmem:[#allocation2 + $0x21] sm:$0xff]  ;;  %v457_v46 = vld [vmem:[#allocation9 + $0x70] sm:$0xff]  ;;  %v475_v47 = vld [vmem:[#allocation9 + $0xd8] sm:$0xff] }
  0x36   :  { %1264 = vmatprep.mubr.msk.f32.mxu0 %vm71_vm1, %v88_v21  ;;  %1285 = vmatpush3.msra.mxu1 %v80_v20  ;;  %v295_v32 = vld [vmem:[#allocation2 + $0x2] sm:$0xff]  ;;  %v297_v39 = vld [vmem:[#allocation2 + $0x1a] sm:$0xff]  ;;  %v474_v49 = vld [vmem:[#allocation9 + $0xd0] sm:$0xff] }
  0x37   :  { %1286 = vmatprep.mubr.msk.f32.mxu1 %vm71_vm1, %v76_v22  ;;  %1265 = vmatmul.mubr.msk.f32.vlgmr.msra.gmra.mxu0 %vm71_vm1, %v89_v23  ;;  %v298_v40 = vld [vmem:[#allocation2 + $0x22] sm:$0xff]  ;;  %v454_v52 = vld [vmem:[#allocation9 + $0x58] sm:$0xff]  ;;  %v453_v54 = vld [vmem:[#allocation9 + $0x50] sm:$0xff] }
  0x38   :  { %1287 = vmatmul.mubr.msk.f32.vlgmr.msra.gmra.mxu1 %vm71_vm1, %v77_v24  ;;  %1292 = vmatprep.subr.mxu0 %v307_v25  ;;  %v456_v48 = vld [vmem:[#allocation9 + $0x68] sm:$0xff]  ;;  %v455_v50 = vld [vmem:[#allocation9 + $0x60] sm:$0xff]  ;;  %v471_v55 = vld [vmem:[#allocation9 + $0xb8] sm:$0xff] }
  0x39   :  { %1267 = vmatprep.mubr.msk.f32.mxu0 %vm71_vm1, %v90_v26  ;;  %1293 = vmatpush3.msra.mxu0 %v307_v25  ;;  %v473_v51 = vld [vmem:[#allocation9 + $0xc8] sm:$0xff]  ;;  %v472_v53 = vld [vmem:[#allocation9 + $0xc0] sm:$0xff]  ;;  %v470_v56 = vld [vmem:[#allocation9 + $0xb0] sm:$0xff] }
  0x3a   :  { %1289 = vmatprep.mubr.msk.f32.mxu1 %vm71_vm1, %v78_v27  ;;  %1294 = vmatprep.subr.mxu0 %v306_v28  ;;  %v469_v57 = vld [vmem:[#allocation9 + $0xa8] sm:$0xff]  ;;  %v468_v59 = vld [vmem:[#allocation9 + $0xa0] sm:$0xff]  ;;  %v467_v61 = vld [vmem:[#allocation9 + $0x98] sm:$0xff] }
  0x3b   :  { %1295 = vmatpush3.msra.mxu0 %v306_v28  ;;  %1314 = vmatprep.subr.mxu1 %v479_v41  ;;  %v452_v58 = vld [vmem:[#allocation9 + $0x48] sm:$0xff]  ;;  %v451_v60 = vld [vmem:[#allocation9 + $0x40] sm:$0xff]  ;;  %v450_v62 = vld [vmem:[#allocation9 + $0x38] sm:$0xff] }
  0x3c   :  { %1290 = vmatmul.mubr.msk.f32.gmra.mxu1 %vm71_vm1, %v79_v29  ;;  %1296 = vmatprep.subr.mxu0 %v305_v30  ;;  %v466_v63 = vld [vmem:[#allocation9 + $0x90] sm:$0xff]  ;;  %v465_v1 = vld [vmem:[#allocation9 + $0x88] sm:$0xff]  ;;  %v464_v3 = vld [vmem:[#allocation9 + $0x80] sm:$0xff] }
  0x3d   :  { %1268 = vmatmul.mubr.msk.f32.gmra.mxu0 %vm71_vm1, %v91_v31  ;;  %1315 = vmatpush3.msra.mxu1 %v479_v41  ;;  %v449_v0 = vld [vmem:[#allocation9 + $0x30] sm:$0xff]  ;;  %v448_v2 = vld [vmem:[#allocation9 + $0x28] sm:$0xff]  ;;  %v447_v4 = vld [vmem:[#allocation9 + $0x20] sm:$0xff] }
  0x3e   :  { %1297 = vmatpush3.msra.mxu0 %v305_v30  ;;  %1308 = vmatprep.mubr.msk.f32.mxu0 %vm71_vm1, %v295_v32  ;;  %v670_v5 = vld [vmem:[#allocation9 + $0x178] sm:$0xff]  ;;  %v445_v7 = vld [vmem:[#allocation9 + $0x10] sm:$0xff]  ;;  %v444_v8 = vld [vmem:[#allocation9 + $0x8] sm:$0xff] }
  0x3f   :  { %1298 = vmatprep.subr.mxu0 %v304_v33  ;;  %1316 = vmatprep.subr.mxu1 %v478_v42  ;;  %v446_v6 = vld [vmem:[#allocation9 + $0x18] sm:$0xff]  ;;  %v443_v9 = vld [vmem:[#allocation9] sm:$0xff] }
  0x40   :  { %1299 = vmatpush3.msra.mxu0 %v304_v33  ;;  %1317 = vmatpush3.msra.mxu1 %v478_v42  ;;  %v1148_v19 = vld [vmem:[%s1728_s2] ss:$0 sm:$0xff]  ;;  %v1149_v23 = vld [vmem:[%s1728_s2 + $0x1] ss:$0 sm:$0xff] }
  0x41   :  { %1300 = vmatprep.subr.mxu0 %v303_v34  ;;  %1318 = vmatprep.subr.mxu1 %v477_v43 }
  0x42   :  { %1301 = vmatpush3.msra.mxu0 %v303_v34  ;;  %1319 = vmatpush3.msra.mxu1 %v477_v43  ;;  %v669_v43 = vld [vmem:[#allocation9 + $0x170] sm:$0xff] }
  0x43   :  { %1302 = vmatprep.subr.mxu0 %v302_v35  ;;  %1320 = vmatprep.subr.mxu1 %v476_v44 }
  0x44   :  { %1303 = vmatpush3.msra.mxu0 %v302_v35  ;;  %1321 = vmatpush3.msra.mxu1 %v476_v44 }
  0x45   :  { %1304 = vmatprep.subr.mxu0 %v301_v36  ;;  %1322 = vmatprep.subr.mxu1 %v475_v47 }
  0x46   :  { %1305 = vmatpush3.msra.mxu0 %v301_v36  ;;  %1323 = vmatpush3.msra.mxu1 %v475_v47  ;;  %v666_v47 = vld [vmem:[#allocation9 + $0x158] sm:$0xff] }
  0x47   :  { %1306 = vmatprep.subr.mxu0 %v300_v37  ;;  %1324 = vmatprep.subr.mxu1 %v474_v49 }
  0x48   :  { %1307 = vmatpush3.msra.mxu0 %v300_v37  ;;  %1325 = vmatpush3.msra.mxu1 %v474_v49 }
  0x49   :  { %1309 = vmatmul.mubr.msk.f32.vlgmr.msra.gmra.mxu0 %vm71_vm1, %v296_v38  ;;  %1352 = vmatprep.subr.mxu0 %v458_v45 }
  0x4a   :  { %1311 = vmatprep.mubr.msk.f32.mxu0 %vm71_vm1, %v297_v39  ;;  %1353 = vmatpush3.msra.mxu0 %v458_v45  ;;  %v668_v45 = vld [vmem:[#allocation9 + $0x168] sm:$0xff] }
  0x4b   :  { %1354 = vmatprep.subr.mxu0 %v457_v46  ;;  %1326 = vmatprep.subr.mxu1 %v473_v51 }
  0x4c   :  { %1355 = vmatpush3.msra.mxu0 %v457_v46  ;;  %1327 = vmatpush3.msra.mxu1 %v473_v51  ;;  %v667_v46 = vld [vmem:[#allocation9 + $0x160] sm:$0xff]  ;;  %v665_v51 = vld [vmem:[#allocation9 + $0x150] sm:$0xff] }
  0x4d   :  { %1312 = vmatmul.mubr.msk.f32.gmra.mxu0 %vm71_vm1, %v298_v40  ;;  %1356 = vmatprep.subr.mxu0 %v456_v48 }
  0x4e   :  { %1357 = vmatpush3.msra.mxu0 %v456_v48  ;;  %1328 = vmatprep.subr.mxu1 %v472_v53 }
  0x4f   :  { %1358 = vmatprep.subr.mxu0 %v455_v50  ;;  %1329 = vmatpush3.msra.mxu1 %v472_v53 }
  0x50   :  { %1359 = vmatpush3.msra.mxu0 %v455_v50  ;;  %1330 = vmatprep.subr.mxu1 %v471_v55 }
  0x51   :  { %1360 = vmatprep.subr.mxu0 %v454_v52  ;;  %1331 = vmatpush3.msra.mxu1 %v471_v55  ;;  %v663_v55 = vld [vmem:[#allocation9 + $0x140] sm:$0xff] }
  0x52   :  { %1361 = vmatpush3.msra.mxu0 %v454_v52  ;;  %1332 = vmatprep.subr.mxu1 %v470_v56 }
  0x53   :  { %1362 = vmatprep.subr.mxu0 %v453_v54  ;;  %1333 = vmatpush3.msra.mxu1 %v470_v56  ;;  %v662_v56 = vld [vmem:[#allocation9 + $0x138] sm:$0xff] }
  0x54   :  { %1363 = vmatpush3.msra.mxu0 %v453_v54  ;;  %1334 = vmatprep.subr.mxu1 %v469_v57  ;;  %v664_v54 = vld [vmem:[#allocation9 + $0x148] sm:$0xff] }
  0x55   :  { %1364 = vmatprep.subr.mxu0 %v452_v58  ;;  %1335 = vmatpush3.msra.mxu1 %v469_v57  ;;  %v661_v57 = vld [vmem:[#allocation9 + $0x130] sm:$0xff] }
  0x56   :  { %1365 = vmatpush3.msra.mxu0 %v452_v58  ;;  %1336 = vmatprep.subr.mxu1 %v468_v59  ;;  %v660_v58 = vld [vmem:[#allocation9 + $0x128] sm:$0xff] }
  0x57   :  { %1366 = vmatprep.subr.mxu0 %v451_v60  ;;  %1337 = vmatpush3.msra.mxu1 %v468_v59  ;;  %v659_v59 = vld [vmem:[#allocation9 + $0x120] sm:$0xff] }
  0x58   :  { %1367 = vmatpush3.msra.mxu0 %v451_v60  ;;  %1338 = vmatprep.subr.mxu1 %v467_v61  ;;  %v658_v60 = vld [vmem:[#allocation9 + $0x118] sm:$0xff] }
  0x59   :  { %1368 = vmatprep.subr.mxu0 %v450_v62  ;;  %1339 = vmatpush3.msra.mxu1 %v467_v61  ;;  %v657_v61 = vld [vmem:[#allocation9 + $0x110] sm:$0xff] }
  0x5a   :  { %1369 = vmatpush3.msra.mxu0 %v450_v62  ;;  %1340 = vmatprep.subr.mxu1 %v466_v63  ;;  %v656_v62 = vld [vmem:[#allocation9 + $0x108] sm:$0xff] }
  0x5b   :  { %1370 = vmatprep.subr.mxu0 %v449_v0  ;;  %1341 = vmatpush3.msra.mxu1 %v466_v63  ;;  %v655_v63 = vld [vmem:[#allocation9 + $0x100] sm:$0xff] }
  0x5c   :  { %1371 = vmatpush3.msra.mxu0 %v449_v0  ;;  %1342 = vmatprep.subr.mxu1 %v465_v1 }
  0x5d   :  { %1372 = vmatprep.subr.mxu0 %v448_v2  ;;  %1343 = vmatpush3.msra.mxu1 %v465_v1 }
  0x5e   :  { %1373 = vmatpush3.msra.mxu0 %v448_v2  ;;  %1344 = vmatprep.subr.mxu1 %v464_v3 }
  0x5f   :  { %1374 = vmatprep.subr.mxu0 %v447_v4  ;;  %1345 = vmatpush3.msra.mxu1 %v464_v3 }
  0x60   :  { %1375 = vmatpush3.msra.mxu0 %v447_v4  ;;  %1390 = vmatprep.subr.mxu1 %v670_v5 }
  0x61   :  { %1376 = vmatprep.subr.mxu0 %v446_v6 }
  0x62   :  { %1377 = vmatpush3.msra.mxu0 %v446_v6 }
  0x63   :  { %1378 = vmatprep.subr.mxu0 %v445_v7 }
  0x64   :  { %1379 = vmatpush3.msra.mxu0 %v445_v7 }
  0x65   :  { %1380 = vmatprep.subr.mxu0 %v444_v8 }
  0x66   :  { %1381 = vmatpush3.msra.mxu0 %v444_v8  ;;  %v1529_v8 = vmov 1983009808  }
  0x67   :  { %1382 = vmatprep.subr.mxu0 %v443_v9 }
  0x68   :  { %1383 = vmatpush3.msra.mxu0 %v443_v9  ;;  %v788_v9 = vunpack.c.l.s4 %v1529_v8 }
  0xf7   :  { %v1266_v10 = vpop.f32.mrf.mxu0 }
  0xf8   :  { %v1288_v11 = vpop.f32.mrf.mxu1 }
  0xf9   :  { %v179_v12 = vpop.f32.mrf.mxu0  ;;  %v282_v17 = vadd.f32 %v1288_v11, %v1266_v10  ;;  %v790_v10 = vlaneseq }
  0xfa   :  { %v276_v14 = vpop.f32.mrf.mxu1 }
  0xfb   :  { %v277_v20 = vadd.f32 %v276_v14, %v179_v12 }
  0xfc   :  { %v1291_v15 = vpop.f32.mrf.mxu1 }
  0xfd   :  { %v1269_v13 = vpop.f32.mrf.mxu0 }
  0xfe   :  { %v286_v22 = vpop.f32.mrf.mxu1  ;;  %v292_v25 = vadd.f32 %v1291_v15, %v1269_v13  ;;  %v1150_v15 = vld [vmem:[%s1730_s4] ss:$0 sm:$0xff] }
  0xff   :  { %v189_v16 = vpop.f32.mrf.mxu0 }
 0x100   :  { %v287_v29 = vadd.f32 %v286_v22, %v189_v16  ;;  %v789_v16 = vunpack.c.0.s8 %v788_v9 }
 0x109   :  { %v1310_v18 = vpop.f32.mrf.mxu0 }
 0x10a   :  { %v406_v21 = vadd.f32 %v1310_v18, %v282_v17  ;;  %v791_v17 = vshrl.u32 %v790_v10, 7 }
 0x10b   :  { %v386_v24 = vpop.f32.mrf.mxu0 }
 0x10c   :  { %v415_v26 = vmul.f32 %v1148_v19, %v406_v21  ;;  %v405_v27 = vadd.f32 %v386_v24, %v277_v20  ;;  %v1151_v21 = vld [vmem:[%s1730_s4 + $0x1] ss:$0 sm:$0xff]  ;;  %s1530_s4 = smov 64  }
 0x10d   :  { %v1313_v28 = vpop.f32.mrf.mxu0 }
 0x10e   :  { %v424_v30 = vadd.f32 %v1149_v23, %v415_v26  ;;  %v414_v31 = vmul.f32 %v1148_v19, %v405_v27  ;;  %v408_v32 = vadd.f32 %v1313_v28, %v292_v25  ;;  %v1608_v26 = vsub.s32 %v789_v16, %v791_v17 }
 0x10f   :  { %v396_v33 = vpop.f32.mrf.mxu0 }
 0x110   :  { %v428_v34 = vmax.f32 %v424_v30, 0.0  ;;  %v423_v35 = vadd.f32 %v1149_v23, %v414_v31  ;;  %v417_v36 = vmul.f32 %v1148_v19, %v408_v32  ;;  %v407_v37 = vadd.f32 %v396_v33, %v287_v29 }
 0x112   :  { %436 = vst [vmem:[#allocation3 + $0x9] sm:$0xff] %v428_v34  ;;  %v427_v38 = vmax.f32 %v423_v35, 0.0  ;;  %v426_v39 = vadd.f32 %v1149_v23, %v417_v36  ;;  %v416_v40 = vmul.f32 %v1148_v19, %v407_v37 }
 0x114   :  { %435 = vst [vmem:[#allocation3 + $0x1] sm:$0xff] %v427_v38  ;;  %v430_v41 = vmax.f32 %v426_v39, 0.0  ;;  %v425_v42 = vadd.f32 %v1149_v23, %v416_v40  ;;  %1346 = vmatprep.mubr.f32.mxu1 %v427_v38 }
 0x115   :  { %1347 = vmatmul.mubr.f32.vlgmr.msra.gmra.mxu1 %v428_v34 }
 0x116   :  { %438 = vst [vmem:[#allocation3 + $0x21] sm:$0xff] %v430_v41  ;;  %v429_v44 = vmax.f32 %v425_v42, 0.0  ;;  %1391 = vmatpush3.msra.mxu1 %v670_v5 }
 0x117   :  { %1392 = vmatprep.subr.mxu1 %v669_v43 }
 0x118   :  { %437 = vst [vmem:[#allocation3 + $0x19] sm:$0xff] %v429_v44  ;;  %1393 = vmatpush3.msra.mxu1 %v669_v43  ;;  %1349 = vmatprep.mubr.f32.mxu1 %v429_v44 }
 0x119   :  { %1394 = vmatprep.subr.mxu1 %v668_v45  ;;  %1350 = vmatmul.mubr.f32.gmra.mxu1 %v430_v41  ;;  %v651_v0 = vld [vmem:[#allocation3 + $0xa] sm:$0xff] }
 0x11a   :  { %1395 = vmatpush3.msra.mxu1 %v668_v45 }
 0x11b   :  { %v439_v48 = vld [vmem:[#allocation3] sm:$0xff]  ;;  %v440_v49 = vld [vmem:[#allocation3 + $0x8] sm:$0xff]  ;;  %1396 = vmatprep.subr.mxu1 %v667_v46 }
 0x11c   :  { %v650_v50 = vld [vmem:[#allocation3 + $0x2] sm:$0xff]  ;;  %1384 = vmatprep.mubr.f32.mxu0 %v439_v48  ;;  %1397 = vmatpush3.msra.mxu1 %v667_v46 }
 0x11d   :  { %1422 = vmatprep.mubr.f32.mxu1 %v650_v50  ;;  %1385 = vmatmul.mubr.f32.vlgmr.msra.gmra.mxu0 %v440_v49  ;;  %v653_v2 = vld [vmem:[#allocation3 + $0x22] sm:$0xff] }
 0x11e   :  { %1398 = vmatprep.subr.mxu1 %v666_v47 }
 0x11f   :  { %v441_v52 = vld [vmem:[#allocation3 + $0x18] sm:$0xff]  ;;  %v442_v53 = vld [vmem:[#allocation3 + $0x20] sm:$0xff]  ;;  %1399 = vmatpush3.msra.mxu1 %v666_v47 }
 0x120   :  { %1387 = vmatprep.mubr.f32.mxu0 %v441_v52  ;;  %1400 = vmatprep.subr.mxu1 %v665_v51  ;;  %v652_v1 = vld [vmem:[#allocation3 + $0x1a] sm:$0xff] }
 0x121   :  { %1388 = vmatmul.mubr.f32.gmra.mxu0 %v442_v53  ;;  %1401 = vmatpush3.msra.mxu1 %v665_v51 }
 0x122   :  { %1402 = vmatprep.subr.mxu1 %v664_v54 }
 0x123   :  { %1403 = vmatpush3.msra.mxu1 %v664_v54 }
 0x124   :  { %1404 = vmatprep.subr.mxu1 %v663_v55 }
 0x125   :  { %1405 = vmatpush3.msra.mxu1 %v663_v55 }
 0x126   :  { %1406 = vmatprep.subr.mxu1 %v662_v56 }
 0x127   :  { %1407 = vmatpush3.msra.mxu1 %v662_v56 }
 0x128   :  { %1408 = vmatprep.subr.mxu1 %v661_v57 }
 0x129   :  { %1409 = vmatpush3.msra.mxu1 %v661_v57 }
 0x12a   :  { %1410 = vmatprep.subr.mxu1 %v660_v58 }
 0x12b   :  { %1411 = vmatpush3.msra.mxu1 %v660_v58 }
 0x12c   :  { %1412 = vmatprep.subr.mxu1 %v659_v59 }
 0x12d   :  { %1413 = vmatpush3.msra.mxu1 %v659_v59 }
 0x12e   :  { %1414 = vmatprep.subr.mxu1 %v658_v60 }
 0x12f   :  { %1415 = vmatpush3.msra.mxu1 %v658_v60 }
 0x130   :  { %1416 = vmatprep.subr.mxu1 %v657_v61 }
 0x131   :  { %1417 = vmatpush3.msra.mxu1 %v657_v61 }
 0x132   :  { %1418 = vmatprep.subr.mxu1 %v656_v62 }
 0x133   :  { %1419 = vmatpush3.msra.mxu1 %v656_v62 }
 0x134   :  { %1420 = vmatprep.subr.mxu1 %v655_v63 }
 0x135   :  { %1421 = vmatpush3.msra.mxu1 %v655_v63 }
 0x136   :  { %1423 = vmatmul.mubr.f32.vlgmr.msra.gmra.mxu1 %v651_v0 }
 0x137   :  { %1425 = vmatprep.mubr.f32.mxu1 %v652_v1 }
 0x13a   :  { %1426 = vmatmul.mubr.f32.gmra.mxu1 %v653_v2 }
 0x1d5   :  { %v1348_v3 = vpop.f32.mrf.mxu1 }
 0x1d7   :  { %v546_v5 = vpop.f32.mrf.mxu1 }
 0x1d9   :  { %v1351_v7 = vpop.f32.mrf.mxu1 }
 0x1db   :  { %v556_v12 = vpop.f32.mrf.mxu1 }
 0x1dd   :  { %v1386_v4 = vpop.f32.mrf.mxu0 }
 0x1de   :  { %v637_v13 = vadd.f32 %v1386_v4, %v1348_v3 }
 0x1df   :  { %v631_v6 = vpop.f32.mrf.mxu0 }
 0x1e0   :  { %v632_v18 = vadd.f32 %v631_v6, %v546_v5 }
 0x1e1   :  { %v1389_v11 = vpop.f32.mrf.mxu0 }
 0x1e2   :  { %v647_v23 = vadd.f32 %v1389_v11, %v1351_v7 }
 0x1e3   :  { %v641_v20 = vpop.f32.mrf.mxu0 }
 0x1e4   :  { %v642_v28 = vadd.f32 %v641_v20, %v556_v12 }
 0x1f6   :  { %v1424_v14 = vpop.f32.mrf.mxu1 }
 0x1f7   :  { %v757_v19 = vadd.f32 %v1424_v14, %v637_v13 }
 0x1f8   :  { %v737_v22 = vpop.f32.mrf.mxu1 }
 0x1f9   :  { %v766_v24 = vmul.f32 %v1150_v15, %v757_v19  ;;  %v756_v25 = vadd.f32 %v737_v22, %v632_v18 }
 0x1fa   :  { %v1427_v27 = vpop.f32.mrf.mxu1 }
 0x1fb   :  { %v775_v29 = vadd.f32 %v1151_v21, %v766_v24  ;;  %v765_v30 = vmul.f32 %v1150_v15, %v756_v25  ;;  %v759_v31 = vadd.f32 %v1427_v27, %v647_v23 }
 0x1fc   :  { %v747_v32 = vpop.f32.mrf.mxu1 }
 0x1fd   :  { %v779_v33 = vmax.f32 %v775_v29, 0.0  ;;  %v774_v34 = vadd.f32 %v1151_v21, %v765_v30  ;;  %v768_v35 = vmul.f32 %v1150_v15, %v759_v31  ;;  %v758_v36 = vadd.f32 %v747_v32, %v642_v28 }
 0x1ff   :  { %v810_v37 = vrot.slane %v779_v33, %v1608_v26  ;;  %v778_v38 = vmax.f32 %v774_v34, 0.0  ;;  %v777_v39 = vadd.f32 %v1151_v21, %v768_v35  ;;  %v767_v40 = vmul.f32 %v1150_v15, %v758_v36 }
 0x200   :  { %v803_v41 = vcombine.high %v779_v33, %v779_v33 }
 0x201   :  { %v818_v42 = vcombine.high %v810_v37, %v810_v37  ;;  %v786_v43 = vcombine.high %v778_v38, %v778_v38  ;;  %v793_v44 = vrot.slane %v778_v38, %v1608_v26  ;;  %v781_v45 = vmax.f32 %v777_v39, 0.0 }
 0x202   :  { %v776_v46 = vadd.f32 %v1151_v21, %v767_v40  ;;  %v899_v47 = vsel %vm870_vm2, %v810_v37, -inf  ;;  %v1617_v56 = vrot.slane %v803_v41, %v1608_v26 }
 0x203   :  { %v801_v48 = vcombine.high %v793_v44, %v793_v44  ;;  %v900_v49 = vrot.slane %v899_v47, 4  ;;  %v871_v50 = vsel %vm870_vm2, %v793_v44, -inf  ;;  %v800_v51 = vrot.slane %v786_v43, %v1608_v26 }
 0x204   :  { %v837_v52 = vcombine.high %v781_v45, %v781_v45  ;;  %v844_v53 = vrot.slane %v781_v45, %v1608_v26  ;;  %v780_v54 = vmax.f32 %v776_v46, 0.0  ;;  %v872_v55 = vrot.slane %v871_v50, 4 }
 0x205   :  { %v901_v57 = vmax.f32 %v899_v47, %v900_v49  ;;  %v885_v58 = vsel %vm870_vm2, %v800_v51, -inf  ;;  %v906_v59 = vsel %vm870_vm2, %v818_v42, -inf  ;;  %v802_v63 = vcombine.high %v800_v51, %v800_v51 }
 0x206   :  { %v1622_v60 = vrot.slane %v837_v52, %v1608_v26  ;;  %v852_v61 = vcombine.high %v844_v53, %v844_v53  ;;  %v827_v62 = vrot.slane %v780_v54, %v1608_v26  ;;  %v873_v1 = vmax.f32 %v871_v50, %v872_v55 }
 0x207   :  { %v902_v0 = vrot.slane %v901_v57, 2  ;;  %v886_v2 = vrot.slane %v885_v58, 4  ;;  %v907_v3 = vrot.slane %v906_v59, 4  ;;  %v820_v4 = vcombine.high %v780_v54, %v780_v54 }
 0x208   :  { %v835_v5 = vcombine.high %v827_v62, %v827_v62  ;;  %v955_v6 = vsel %vm870_vm2, %v844_v53, -inf  ;;  %v878_v7 = vsel %vm870_vm2, %v801_v48, -inf  ;;  %v874_v9 = vrot.slane %v873_v1, 2 }
 0x209   :  { %v903_v8 = vmax.f32 %v901_v57, %v902_v0  ;;  %v887_v10 = vmax.f32 %v885_v58, %v886_v2  ;;  %v908_v11 = vmax.f32 %v906_v59, %v907_v3  ;;  %v956_v12 = vrot.slane %v955_v6, 4 }
 0x20a   :  { %v879_v13 = vrot.slane %v878_v7, 4  ;;  %v892_v14 = vsel %vm870_vm2, %v802_v63, -inf  ;;  %v927_v15 = vsel %vm870_vm2, %v827_v62, -inf  ;;  %v875_v17 = vmax.f32 %v873_v1, %v874_v9 }
 0x20b   :  { %v904_v16 = vrot.slane %v903_v8, 1  ;;  %v888_v18 = vrot.slane %v887_v10, 2  ;;  %v909_v19 = vrot.slane %v908_v11, 2  ;;  %v957_v20 = vmax.f32 %v955_v6, %v956_v12 }
 0x20c   :  { %v880_v21 = vmax.f32 %v878_v7, %v879_v13  ;;  %v893_v22 = vrot.slane %v892_v14, 4  ;;  %v928_v23 = vrot.slane %v927_v15, 4  ;;  %v876_v25 = vrot.slane %v875_v17, 1 }
 0x20d   :  { %v1629_v24 = vmax.f32 %v903_v8, %v904_v16  ;;  %v889_v27 = vmax.f32 %v887_v10, %v888_v18  ;;  %v910_v28 = vmax.f32 %v908_v11, %v909_v19  ;;  %v958_v29 = vrot.slane %v957_v20, 2 }
 0x20e   :  { %v881_v30 = vrot.slane %v880_v21, 2  ;;  %v894_v31 = vmax.f32 %v892_v14, %v893_v22  ;;  %v929_v32 = vmax.f32 %v927_v15, %v928_v23  ;;  %v834_v33 = vrot.slane %v820_v4, %v1608_v26 }
 0x20f   :  { %1007 = vrot.lane.b32.xlu0 %v1629_v24, %s1530_s4  ;;  %v890_v34 = vrot.slane %v889_v27, 1  ;;  %v911_v35 = vrot.slane %v910_v28, 1  ;;  %v962_v36 = vsel %vm870_vm2, %v852_v61, -inf  ;;  %v959_v37 = vmax.f32 %v957_v20, %v958_v29 }
 0x210   :  { %v882_v38 = vmax.f32 %v880_v21, %v881_v30  ;;  %v895_v39 = vrot.slane %v894_v31, 2  ;;  %v930_v40 = vrot.slane %v929_v32, 2  ;;  %v1635_v41 = vmax.f32 %v875_v17, %v876_v25 }
 0x211   :  { %v1637_v42 = vmax.f32 %v889_v27, %v890_v34  ;;  %v963_v43 = vrot.slane %v962_v36, 4  ;;  %v934_v44 = vsel %vm870_vm2, %v835_v5, -inf  ;;  %v960_v26 = vrot.slane %v959_v37, 1 }
 0x212   :  { %v883_v45 = vrot.slane %v882_v38, 1  ;;  %v896_v46 = vmax.f32 %v894_v31, %v895_v39  ;;  %v931_v47 = vmax.f32 %v929_v32, %v930_v40  ;;  %v935_v49 = vrot.slane %v934_v44, 4 }
 0x213   :  { %999 = vrot.lane.b32.xlu0 %v1635_v41, %s1530_s4  ;;  %1003 = vrot.lane.b32.xlu1 %v1637_v42, %s1530_s4  ;;  %v964_v48 = vmax.f32 %v962_v36, %v963_v43  ;;  %v969_v50 = vsel %vm870_vm2, %v1622_v60, -inf  ;;  %v913_v51 = vsel %vm870_vm2, %v1617_v56, -inf  ;;  %v1648_v52 = vmax.f32 %v910_v28, %v911_v35 }
 0x214   :  { %v1650_v53 = vmax.f32 %v959_v37, %v960_v26  ;;  %v1652_v54 = vmax.f32 %v882_v38, %v883_v45  ;;  %v897_v55 = vrot.slane %v896_v46, 1  ;;  %v936_v58 = vmax.f32 %v934_v44, %v935_v49 }
 0x215   :  { %v965_v57 = vrot.slane %v964_v48, 2  ;;  %v970_v59 = vrot.slane %v969_v50, 4  ;;  %v914_v61 = vrot.slane %v913_v51, 4  ;;  %v932_v63 = vrot.slane %v931_v47, 1 }
 0x216   :  { %v1654_v62 = vmax.f32 %v896_v46, %v897_v55  ;;  %v941_v0 = vsel %vm870_vm2, %v834_v33, -inf  ;;  %v819_v1 = vcombine.high %v1617_v56, %v1617_v56  ;;  %v937_v3 = vrot.slane %v936_v58, 2 }
 0x217   :  { %1009 = vrot.lane.b32.xlu0 %v1648_v52, %s1530_s4  ;;  %1023 = vrot.lane.b32.xlu1 %v1650_v53, %s1530_s4  ;;  %v966_v2 = vmax.f32 %v964_v48, %v965_v57  ;;  %v971_v4 = vmax.f32 %v969_v50, %v970_v59  ;;  %v915_v5 = vmax.f32 %v913_v51, %v914_v61  ;;  %v942_v6 = vrot.slane %v941_v0, 4 }
 0x218   :  { %v920_v7 = vsel %vm870_vm2, %v819_v1, -inf  ;;  %v836_v8 = vcombine.high %v834_v33, %v834_v33  ;;  %v853_v9 = vcombine.high %v1622_v60, %v1622_v60  ;;  %v938_v11 = vmax.f32 %v936_v58, %v937_v3 }
 0x219   :  { %v967_v10 = vrot.slane %v966_v2, 1  ;;  %v972_v56 = vrot.slane %v971_v4, 2  ;;  %v916_v12 = vrot.slane %v915_v5, 2  ;;  %v943_v13 = vmax.f32 %v941_v0, %v942_v6 }
 0x21a   :  { %v921_v14 = vrot.slane %v920_v7, 4  ;;  %v948_v15 = vsel %vm870_vm2, %v836_v8, -inf  ;;  %v976_v16 = vsel %vm870_vm2, %v853_v9, -inf  ;;  %v939_v17 = vrot.slane %v938_v11, 1 }
 0x21b   :  { %1001 = vrot.lane.b32.xlu0 %v1652_v54, %s1530_s4  ;;  %1005 = vrot.lane.b32.xlu1 %v1654_v62, %s1530_s4  ;;  %v973_v18 = vmax.f32 %v971_v4, %v972_v56  ;;  %v917_v19 = vmax.f32 %v915_v5, %v916_v12  ;;  %v944_v60 = vrot.slane %v943_v13, 2  ;;  %v949_v21 = vrot.slane %v948_v15, 4 }
 0x21c   :  { %v922_v20 = vmax.f32 %v920_v7, %v921_v14  ;;  %v977_v22 = vrot.slane %v976_v16, 4  ;;  %v1672_v23 = vmax.f32 %v931_v47, %v932_v63  ;;  %v1674_v25 = vmax.f32 %v966_v2, %v967_v10 }
 0x21d   :  { %v974_v27 = vrot.slane %v973_v18, 1  ;;  %v945_v28 = vmax.f32 %v943_v13, %v944_v60  ;;  %v950_v30 = vmax.f32 %v948_v15, %v949_v21  ;;  %v940_v32 = vmax.f32 %v938_v11, %v939_v17 }
 0x21e   :  { %v923_v29 = vrot.slane %v922_v20, 2  ;;  %v978_v31 = vmax.f32 %v976_v16, %v977_v22  ;;  %v918_v33 = vrot.slane %v917_v19, 1 }
 0x21f   :  { %1015 = vrot.lane.b32.xlu0 %v1672_v23, %s1530_s4  ;;  %1025 = vrot.lane.b32.xlu1 %v1674_v25, %s1530_s4  ;;  %v951_v34 = vrot.slane %v950_v30, 2  ;;  %v1680_v35 = vmax.f32 %v973_v18, %v974_v27  ;;  %v946_v36 = vrot.slane %v945_v28, 1 }
 0x220   :  { %v924_v37 = vmax.f32 %v922_v20, %v923_v29  ;;  %v979_v38 = vrot.slane %v978_v31, 2  ;;  %v919_v40 = vmax.f32 %v917_v19, %v918_v33 }
 0x221   :  { %v952_v39 = vmax.f32 %v950_v30, %v951_v34  ;;  %v947_v43 = vmax.f32 %v945_v28, %v946_v36 }
 0x222   :  { %v925_v44 = vrot.slane %v924_v37, 1  ;;  %v980_v45 = vmax.f32 %v978_v31, %v979_v38 }
 0x223   :  { %1017 = vrot.lane.b32.xlu0 %v940_v32, %s1530_s4  ;;  %1027 = vrot.lane.b32.xlu1 %v1680_v35, %s1530_s4  ;;  %v953_v26 = vrot.slane %v952_v39, 1 }
 0x224   :  { %v926_v46 = vmax.f32 %v924_v37, %v925_v44  ;;  %v981_v48 = vrot.slane %v980_v45, 1 }
 0x225   :  { %v954_v47 = vmax.f32 %v952_v39, %v953_v26 }
 0x226   :  { %v1689_v49 = vmax.f32 %v980_v45, %v981_v48 }
 0x227   :  { %1011 = vrot.lane.b32.xlu0 %v919_v40, %s1530_s4  ;;  %1019 = vrot.lane.b32.xlu1 %v947_v43, %s1530_s4 }
 0x22b   :  { %1013 = vrot.lane.b32.xlu0 %v926_v46, %s1530_s4  ;;  %1021 = vrot.lane.b32.xlu1 %v954_v47, %s1530_s4 }
 0x22f   :  { %1029 = vrot.lane.b32.xlu1 %v1689_v49, %s1530_s4 }
 0x281   :  { %v1008_v50 = vpop.permute.xlu0 %1007 }
 0x282   :  { %v1051_v10 = vmax.f32 %v1629_v24, %v1008_v50 }
 0x285   :  { %v1000_v51 = vpop.permute.xlu0 %999  ;;  %v1004_v55 = vpop.permute.xlu1 %1003 }
 0x286   :  { %v1049_v1 = vmax.f32 %v1637_v42, %v1004_v55  ;;  %v1047_v4 = vmax.f32 %v1635_v41, %v1000_v51 }
 0x288   :  { %v1082_v7 = vrot.slane %v1049_v1, 6 }
 0x289   :  { %v1010_v57 = vpop.permute.xlu0 %1009  ;;  %v1024_v58 = vpop.permute.xlu1 %1023 }
 0x28a   :  { %v1052_v56 = vmax.f32 %v1648_v52, %v1010_v57  ;;  %v1059_v16 = vmax.f32 %v1650_v53, %v1024_v58 }
 0x28c   :  { %v1091_v24 = vrot.slane %v1052_v56, 3  ;;  %v1106_v33 = vrot.slane %v1059_v16, 4 }
 0x28d   :  { %v1002_v59 = vpop.permute.xlu0 %1001  ;;  %v1006_v61 = vpop.permute.xlu1 %1005 }
 0x28e   :  { %v1048_v63 = vmax.f32 %v1652_v54, %v1002_v59  ;;  %v1050_v6 = vmax.f32 %v1654_v62, %v1006_v61  ;;  %v1088_v62 = vrot.slane %v1051_v10, 4 }
 0x290   :  { %v1079_v0 = vrot.slane %v1048_v63, 7  ;;  %v1085_v11 = vrot.slane %v1050_v6, 5 }
 0x291   :  { %v1016_v2 = vpop.permute.xlu0 %1015  ;;  %v1026_v3 = vpop.permute.xlu1 %1025 }
 0x292   :  { %v1081_v5 = vsel %vm1080_vm3, %v1079_v0, %v1047_v4  ;;  %v1055_v21 = vmax.f32 %v1672_v23, %v1016_v2  ;;  %v1060_v22 = vmax.f32 %v1674_v25, %v1026_v3 }
 0x293   :  { %v1084_v54 = vsel %vm1083_vm4, %v1082_v7, %v1081_v5 }
 0x294   :  { %v1087_v41 = vsel %vm1086_vm5, %v1085_v11, %v1084_v54  ;;  %v1108_v23 = vrot.slane %v1060_v22, 3 }
 0x295   :  { %v1018_v8 = vpop.permute.xlu0 %1017  ;;  %v1028_v9 = vpop.permute.xlu1 %1027  ;;  %v1090_v18 = vsel %vm1089_vm6, %v1088_v62, %v1087_v41 }
 0x296   :  { %v1056_v42 = vmax.f32 %v940_v32, %v1018_v8  ;;  %v1061_v29 = vmax.f32 %v1680_v35, %v1028_v9  ;;  %v1093_v30 = vsel %vm1092_vm7, %v1091_v24, %v1090_v18 }
 0x298   :  { %v1100_v17 = vrot.slane %v1056_v42, 7  ;;  %v1110_v39 = vrot.slane %v1061_v29, 2 }
 0x299   :  { %v1012_v12 = vpop.permute.xlu0 %1011  ;;  %v1020_v13 = vpop.permute.xlu1 %1019 }
 0x29a   :  { %v1053_v14 = vmax.f32 %v919_v40, %v1012_v12  ;;  %v1057_v15 = vmax.f32 %v947_v43, %v1020_v13  ;;  %v1101_v53 = vsel %vm1080_vm3, %v1100_v17, %v1055_v21 }
 0x29c   :  { %v1094_v19 = vrot.slane %v1053_v14, 2  ;;  %v1102_v60 = vrot.slane %v1057_v15, 6 }
 0x29d   :  { %v1014_v20 = vpop.permute.xlu0 %1013  ;;  %v1022_v52 = vpop.permute.xlu1 %1021 }
 0x29e   :  { %v1054_v27 = vmax.f32 %v926_v46, %v1014_v20  ;;  %v1058_v28 = vmax.f32 %v954_v47, %v1022_v52  ;;  %v1096_v34 = vsel %vm1095_vm8, %v1094_v19, %v1093_v30  ;;  %v1103_v36 = vsel %vm1083_vm4, %v1102_v60, %v1101_v53 }
 0x2a0   :  { %v1097_v31 = vrot.slane %v1054_v27, 1  ;;  %v1104_v32 = vrot.slane %v1058_v28, 5 }
 0x2a1   :  { %v1030_v37 = vpop.permute.xlu1 %1029 }
 0x2a2   :  { %v1099_v25 = vsel %vm1098_vm9, %v1097_v31, %v1096_v34  ;;  %v1105_v38 = vsel %vm1086_vm5, %v1104_v32, %v1103_v36  ;;  %v1062_v35 = vmax.f32 %v1689_v49, %v1030_v37 }
 0x2a3   :  { %1116 = vst.msk [vmem:[#allocation10] sm:$0xff] %vm71_vm1, %v1099_v25  ;;  %v1107_v40 = vsel %vm1089_vm6, %v1106_v33, %v1105_v38 }
 0x2a4   :  { %v1109_v43 = vsel %vm1092_vm7, %v1108_v23, %v1107_v40  ;;  %v1112_v44 = vrot.slane %v1062_v35, 1 }
 0x2a5   :  { %v1111_v26 = vsel %vm1095_vm8, %v1110_v39, %v1109_v43 }
 0x2a6   :  { %v1113_v45 = vsel %vm1098_vm9, %v1112_v44, %v1111_v26 }
 0x2a7   :  { %1117 = vst.msk [vmem:[#allocation10 + $0x8] sm:$0xff] %vm71_vm1, %v1113_v45 }
 0x2a8   :  { %1508 = shalt.err (!%p1505_p5)
}
 0x2a9   :  { %1129 = dma.vmem_to_hbm [thread:$0]  %s1124_s15, 256, %s1731_s5, [#allocation6], %s1525_s23, %s1525_s23, %s1526_s24  }
 0x2aa   :  { %1521 = dma.done.wait [#allocation6], 256  }
 0x2ab   :  { %1522 = vsyncadd [#allocation6], 4294967040 }
 0x2ac   :  { %1133 = vsyncpa [#allocation5], 1 }
 0x2ad   :  { %1134 = vsyncpa [#allocation8], 1 }
 0x2ae   :  { %1135 = vsyncpa [#allocation6], 1 }

</bundles_post_ra>
